<compile_context>
chip_gen: v7x
topology: tpu7x:2x2x1
jax: 0.10.0
libtpu: 0.0.40
codegen_flags: <defaults>
</compile_context>

<pallas_src>
import math
import functools

import jax
import jax.numpy as jnp
from jax.experimental import pallas as pl
from jax.experimental.pallas import tpu as pltpu


_VMEM_LIMIT = 48 * 1024 * 1024  # safe on v5e/v6e (128 MiB phys) and v7x (64 MiB)


def _pick_tile(dim, cap, multiple):
    """Largest tile <= cap that divides dim and is a multiple of `multiple`,
    falling back to the full dimension (full-extent blocks are always legal)."""
    if dim <= cap:
        return dim
    for t in range(cap, 0, -1):
        if dim % t == 0 and t % multiple == 0:
            return t
    return dim


# ----------------------------------------------------------------------------
# Kernel 1: fused Q/K/V projection.
# grid = (B, S_tiles, Htot).  The stacked activation tensor [n_src, B, S, Hin]
# supplies exactly one (tS, Hin) bf16 tile per step (index_map selects the
# query/key/value source from the head index), the packed head-major bf16
# weight [Htot, Hin, D] supplies one head slice, and the result is written
# directly into the attention layout [B, Htot_pad, S, D].
# ----------------------------------------------------------------------------
def _qkv_proj_kernel(x_ref, w_ref, b_ref, o_ref):
    x = x_ref[0, 0]                                   # (tS, Hin) bf16
    w = w_ref[0]                                      # (Hin, D)  bf16
    y = jnp.dot(x, w, preferred_element_type=jnp.float32)
    o_ref[0, 0] = (y + b_ref[0]).astype(o_ref.dtype)  # bias stays f32


def qkv_projection(x, w_qkv, b_qkv, *, heads, kv_heads, n_rep, out_dtype):
    """x: [n_src, B, S, Hin] bf16 -> packed qkv [B, Htot_pad, S, D] bf16."""
    n_src, B, S, Hin = x.shape
    Htot, _, D = w_qkv.shape
    # Pad head axis so the attention q BlockSpec (head block = n_rep) divides it.
    htot_pad = ((Htot + n_rep - 1) // n_rep) * n_rep
    tS = _pick_tile(S, 512, 8)

    def x_map(b, si, j):
        if n_src == 1:          # self-attention fast path: single source tensor
            return (0, b, si, 0)
        src = jnp.where(j < heads, 0, jnp.where(j < heads + kv_heads, 1, 2))
        return (src, b, si, 0)

    return pl.pallas_call(
        _qkv_proj_kernel,
        out_shape=jax.ShapeDtypeStruct((B, htot_pad, S, D), out_dtype),
        grid_spec=pltpu.PrefetchScalarGridSpec(
            num_scalar_prefetch=0,
            grid=(B, S // tS, Htot),
            in_specs=[
                pl.BlockSpec((1, 1, tS, Hin), x_map),
                pl.BlockSpec((1, Hin, D), lambda b, si, j: (j, 0, 0)),
                pl.BlockSpec((1, 1, D), lambda b, si, j: (j, 0, 0)),
            ],
            out_specs=pl.BlockSpec((1, 1, tS, D), lambda b, si, j: (b, j, si, 0)),
        ),
        compiler_params=pltpu.CompilerParams(
            dimension_semantics=("parallel", "parallel", "parallel"),
            vmem_limit_bytes=_VMEM_LIMIT),
    )(x, w_qkv, b_qkv)
    # TODO(synk): for D < 128 the per-head N underfills the 256-wide v6e/v7x MXU
    # and stores are not lane-dense; head-grouping (G = 256 // D) would fix it.


# ----------------------------------------------------------------------------
# Kernel 2: KV-tiled online-softmax attention (flash), one GQA group per step.
# grid = (B, Hkv, S//tQ, S//tKV); the K/V tile is loaded once and reused by all
# n_rep query heads of the group (statically unrolled), cutting K/V HBM
# traffic by n_rep.  1/sqrt(D) is already folded into Wq/bq.
# ----------------------------------------------------------------------------
def _flash_attn_kernel(q_ref, k_ref, v_ref, m_ref, o_ref,
                       m_sc, l_sc, acc_sc, *, n_rep):
    ki = pl.program_id(3)

    @pl.when(ki == 0)
    def _():
        m_sc[...] = jnp.full_like(m_sc, -jnp.inf)
        l_sc[...] = jnp.zeros_like(l_sc)
        acc_sc[...] = jnp.zeros_like(acc_sc)

    k = k_ref[0, 0]                                  # (tKV, D) bf16
    v = v_ref[0, 0]                                  # (tKV, D) bf16
    mask = m_ref[0, 0].astype(jnp.float32)           # (tQ, tKV), streamed as bf16

    for r in range(n_rep):                           # static GQA-group unroll
        q = q_ref[0, r]                              # (tQ, D) bf16, pre-scaled
        # q @ k^T without an explicit transpose: contract dim 1 with dim 1.
        s = jax.lax.dot_general(q, k, (((1,), (1,)), ((), ())),
                                preferred_element_type=jnp.float32)
        s = s + mask
        m_prev = m_sc[r]
        m_new = jnp.maximum(m_prev, jnp.max(s, axis=-1, keepdims=True))
        alpha = jnp.exp(m_prev - m_new)
        p = jnp.exp(s - m_new)
        l_sc[r] = alpha * l_sc[r] + jnp.sum(p, axis=-1, keepdims=True)
        acc_sc[r] = alpha * acc_sc[r] + jnp.dot(
            p.astype(jnp.bfloat16), v, preferred_element_type=jnp.float32)
        m_sc[r] = m_new

    # TODO(synk): dropout on probs is identity (eval); causal-tile skipping is
    # not applied because arbitrary additive masks must be supported.
    @pl.when(ki == pl.num_programs(3) - 1)
    def _():
        for r in range(n_rep):
            o_ref[0, r] = (acc_sc[r] / l_sc[r]).astype(o_ref.dtype)


def attention(qkv, mask, *, heads, kv_heads, head_dim, out_dtype):
    """qkv: [B, Htot_pad, S, D], mask: [B, 1, S, S] (bf16) -> ctx [B, H, S, D]."""
    B, _, S, D = qkv.shape
    n_rep = heads // kv_heads
    # Keep n_rep * tQ ~ 512 q-rows per step so K/V re-streaming stays low.
    tQ = _pick_tile(S, max(8, 512 // n_rep), 8)
    tKV = _pick_tile(S, 512, 128)   # last dim of the mask block -> 128-aligned
    kernel = functools.partial(_flash_attn_kernel, n_rep=n_rep)
    return pl.pallas_call(
        kernel,
        out_shape=jax.ShapeDtypeStruct((B, heads, S, D), out_dtype),
        grid_spec=pltpu.PrefetchScalarGridSpec(
            num_scalar_prefetch=0,
            grid=(B, kv_heads, S // tQ, S // tKV),
            in_specs=[
                pl.BlockSpec((1, n_rep, tQ, D),
                             lambda b, g, qi, ki: (b, g, qi, 0)),
                pl.BlockSpec((1, 1, tKV, D),
                             lambda b, g, qi, ki: (b, heads + g, ki, 0)),
                pl.BlockSpec((1, 1, tKV, D),
                             lambda b, g, qi, ki: (b, heads + kv_heads + g, ki, 0)),
                pl.BlockSpec((1, 1, tQ, tKV),
                             lambda b, g, qi, ki: (b, 0, qi, ki)),
            ],
            out_specs=pl.BlockSpec((1, n_rep, tQ, D),
                                   lambda b, g, qi, ki: (b, g, qi, 0)),
            scratch_shapes=[
                pltpu.VMEM((n_rep, tQ, 1), jnp.float32),   # running max
                pltpu.VMEM((n_rep, tQ, 1), jnp.float32),   # running denom
                pltpu.VMEM((n_rep, tQ, D), jnp.float32),   # running numerator
            ],
        ),
        compiler_params=pltpu.CompilerParams(
            dimension_semantics=("parallel", "parallel", "parallel", "arbitrary"),
            vmem_limit_bytes=_VMEM_LIMIT),
    )(qkv, qkv, qkv, mask)


# ----------------------------------------------------------------------------
# Kernel 3: output projection, fusing the "unshape" transpose.
# ctx stays in [B, H, S, D]; the head axis is the reduction axis of the grid,
# accumulated in f32 VMEM scratch against the head-major bf16 weight [H, D, hidden].
# ----------------------------------------------------------------------------
def _out_proj_kernel(ctx_ref, w_ref, b_ref, o_ref, acc_ref):
    h = pl.program_id(2)

    @pl.when(h == 0)
    def _():
        acc_ref[...] = jnp.zeros_like(acc_ref)

    acc_ref[...] += jnp.dot(ctx_ref[0, 0], w_ref[0],
                            preferred_element_type=jnp.float32)

    @pl.when(h == pl.num_programs(2) - 1)
    def _():
        o_ref[0] = (acc_ref[...] + b_ref[...]).astype(o_ref.dtype)


def output_projection(ctx, w_o, b_o, *, out_dtype):
    """ctx: [B, H, S, D] bf16, w_o: [H, D, hidden] bf16, b_o: [1, hidden] f32."""
    B, H, S, D = ctx.shape
    hidden = w_o.shape[-1]
    tS = _pick_tile(S, 512, 8)
    return pl.pallas_call(
        _out_proj_kernel,
        out_shape=jax.ShapeDtypeStruct((B, S, hidden), out_dtype),
        grid_spec=pltpu.PrefetchScalarGridSpec(
            num_scalar_prefetch=0,
            grid=(B, S // tS, H),
            in_specs=[
                pl.BlockSpec((1, 1, tS, D), lambda b, si, h: (b, h, si, 0)),
                pl.BlockSpec((1, D, hidden), lambda b, si, h: (h, 0, 0)),
                pl.BlockSpec((1, hidden), lambda b, si, h: (0, 0)),
            ],
            out_specs=pl.BlockSpec((1, tS, hidden), lambda b, si, h: (b, si, 0)),
            scratch_shapes=[pltpu.VMEM((tS, hidden), jnp.float32)],
        ),
        compiler_params=pltpu.CompilerParams(
            dimension_semantics=("parallel", "parallel", "arbitrary"),
            vmem_limit_bytes=_VMEM_LIMIT),
    )(ctx, w_o, b_o)


# ----------------------------------------------------------------------------
# Module wrapper
# ----------------------------------------------------------------------------
class MultiHeadedAttentionPallas:
    def __init__(self, hidden_size, heads_num, attention_head_size,
                 n_local_kv_heads, dropout, has_bias=True, with_scale=True,
                 key=None):
        assert heads_num % n_local_kv_heads == 0
        self.hidden_size = hidden_size
        self.heads_num = heads_num
        self.per_head_size = attention_head_size
        self.n_local_kv_heads = n_local_kv_heads
        self.n_rep = heads_num // n_local_kv_heads
        self.inner_hidden_size = heads_num * attention_head_size
        self.kv_embed_dim = n_local_kv_heads * attention_head_size
        self.with_scale = with_scale
        self.has_bias = has_bias

        key = jax.random.PRNGKey(0) if key is None else key
        ks = jax.random.split(key, 8)

        def init_linear(kw, kb, out_f, in_f):
            bound = 1.0 / math.sqrt(in_f)
            w = jax.random.uniform(kw, (out_f, in_f), jnp.float32, -bound, bound)
            b = (jax.random.uniform(kb, (out_f,), jnp.float32, -bound, bound)
                 if has_bias else jnp.zeros((out_f,), jnp.float32))
            return w, b

        H, D, Hkv = heads_num, attention_head_size, n_local_kv_heads
        # PyTorch nn.Linear layout [out_features, in_features] -- kept (f32) for
        # the pure-JAX reference; kernels use the packed bf16 copies below.
        self.wq, self.bq = init_linear(ks[0], ks[1], self.inner_hidden_size, hidden_size)
        self.wk, self.bk = init_linear(ks[2], ks[3], self.kv_embed_dim, hidden_size)
        self.wv, self.bv = init_linear(ks[4], ks[5], self.kv_embed_dim, hidden_size)
        self.wo, self.bo = init_linear(ks[6], ks[7], hidden_size, self.inner_hidden_size)

        # One-time host-side packing (free at call time):
        #   * fused, head-major, pre-transposed QKV weight [Htot, Hin, D], bf16,
        #     with 1/sqrt(D) folded into the q-head slices (and bq);
        #   * head-major, pre-transposed bf16 output weight [H, D, hidden].
        scale = (1.0 / math.sqrt(float(D))) if with_scale else 1.0
        self.w_qkv = jnp.concatenate([
            (self.wq * scale).reshape(H, D, hidden_size),
            self.wk.reshape(Hkv, D, hidden_size),
            self.wv.reshape(Hkv, D, hidden_size)], axis=0
        ).transpose(0, 2, 1).astype(jnp.bfloat16)
        self.b_qkv = jnp.concatenate([
            (self.bq * scale).reshape(H, 1, D),
            self.bk.reshape(Hkv, 1, D),
            self.bv.reshape(Hkv, 1, D)], axis=0)                 # f32 (tiny)
        self.wo_t = self.wo.T.reshape(H, D, hidden_size).astype(jnp.bfloat16)
        self.bo_r = self.bo.reshape(1, hidden_size)              # f32 (tiny)

    def __call__(self, key, value, query, mask):
        H, D, Hkv = self.heads_num, self.per_head_size, self.n_local_kv_heads

        # One bf16 cast pass over the activations (outside the kernels).
        if (query is key) and (key is value):
            x = query.astype(jnp.bfloat16)[None]                 # [1, B, S, Hin]
        else:
            x = jnp.stack([query, key, value], 0).astype(jnp.bfloat16)

        qkv = qkv_projection(x, self.w_qkv, self.b_qkv, heads=H, kv_heads=Hkv,
                             n_rep=self.n_rep,
                             out_dtype=jnp.bfloat16)             # [B, Htot_pad, S, D]

        ctx = attention(qkv, mask.astype(jnp.bfloat16),          # bf16 mask stream
                        heads=H, kv_heads=Hkv, head_dim=D,
                        out_dtype=jnp.bfloat16)                  # [B, H, S, D]

        out = output_projection(ctx, self.wo_t, self.bo_r,
                                out_dtype=query.dtype)           # [B, S, hidden]
        return out, None  # prev_attn_out is None (has_residual_attention=False)


# ----------------------------------------------------------------------------
# Pure-JAX reference (mirrors the PyTorch forward) for verification.
# ----------------------------------------------------------------------------
def reference_forward(mod, key, value, query, mask):
    B, S, _ = query.shape
    H, D, Hkv, n_rep = mod.heads_num, mod.per_head_size, mod.n_local_kv_heads, mod.n_rep
    q = query @ mod.wq.T + mod.bq
    k = key @ mod.wk.T + mod.bk
    v = value @ mod.wv.T + mod.bv
    q = q.reshape(B, S, H, D)
    k = k.reshape(B, S, Hkv, D)
    v = v.reshape(B, S, Hkv, D)
    k = jnp.repeat(k, n_rep, axis=2)
    v = jnp.repeat(v, n_rep, axis=2)
    q = q.transpose(0, 2, 1, 3)
    k = k.transpose(0, 2, 1, 3)
    v = v.transpose(0, 2, 1, 3)
    scores = jnp.einsum("bhqd,bhkd->bhqk", q, k)
    if mod.with_scale:
        scores = scores / math.sqrt(float(D))
    scores = scores + mask
    probs = jax.nn.softmax(scores, axis=-1)
    ctx = jnp.einsum("bhqk,bhkd->bhqd", probs, v)
    ctx = ctx.transpose(0, 2, 1, 3).reshape(B, S, mod.inner_hidden_size)
    return ctx @ mod.wo.T + mod.bo


if __name__ == "__main__":
    # Small config: batch=2, seq=8, hidden=32, heads=4, head_dim=8, kv_heads=2
    B, S, HID = 2, 8, 32
    HEADS, HEAD_DIM, KV_HEADS = 4, 8, 2

    rng = jax.random.PRNGKey(0)
    k_in, k_q, k_k, k_v = jax.random.split(rng, 4)

    query = jax.random.normal(k_q, (B, S, HID), jnp.float32)
    key_in = jax.random.normal(k_k, (B, S, HID), jnp.float32)
    value_in = jax.random.normal(k_v, (B, S, HID), jnp.float32)

    # additive attention mask [B, 1, S, S]: causal, masked positions = -10000
    causal = jnp.tril(jnp.ones((S, S), jnp.float32))
    mask = ((1.0 - causal) * -10000.0)[None, None, :, :]
    mask = jnp.broadcast_to(mask, (B, 1, S, S))

    mod = MultiHeadedAttentionPallas(
        hidden_size=HID, heads_num=HEADS, attention_head_size=HEAD_DIM,
        n_local_kv_heads=KV_HEADS, dropout=0.0, has_bias=True,
        with_scale=True, key=k_in)

    out, prev_attn = mod(key_in, value_in, query, mask)
    out = jax.block_until_ready(out)

    ref = reference_forward(mod, key_in, value_in, query, mask)
    assert out.shape == (B, S, HID)
    # bf16 MXU operands + bf16 intermediates/mask -> relaxed tolerance vs f32 ref.
    max_err = float(jnp.max(jnp.abs(out - ref)))
    assert jnp.allclose(out, ref, atol=5e-2, rtol=5e-2), \
        f"mismatch vs reference (max abs err {max_err})"

    print("KERNEL_OK")
</pallas_src>

<mosaic_0001>
module attributes {stable_mosaic.version = 11 : i64} {
  func.func @_qkv_proj_kernel(%arg0: i32, %arg1: i32, %arg2: i32, %arg3: memref<1x1x8x32xbf16, #tpu.memory_space<vmem>>, %arg4: memref<1x32x8xbf16, #tpu.memory_space<vmem>>, %arg5: memref<1x1x8xf32, #tpu.memory_space<vmem>>, %arg6: memref<1x1x8x8xbf16, #tpu.memory_space<vmem>>) attributes {dimension_semantics = [#tpu.dimension_semantics<parallel>, #tpu.dimension_semantics<parallel>, #tpu.dimension_semantics<parallel>], iteration_bounds = array<i64: 2, 1, 8>, scalar_prefetch = 0 : i64, scratch_operands = 0 : i64, tpu.core_type = #tpu.core_type<tc>, window_params = [{transform_indices = @transform_0, window_bounds = array<i64: 1, 1, 8, 32>}, {transform_indices = @transform_1, window_bounds = array<i64: 1, 32, 8>}, {transform_indices = @transform_2, window_bounds = array<i64: 1, 1, 8>}, {transform_indices = @transform_3, window_bounds = array<i64: 1, 1, 8, 8>}]} {
    %c0 = arith.constant 0 : index
    %c0_0 = arith.constant 0 : index
    %c0_1 = arith.constant 0 : index
    %c0_2 = arith.constant 0 : index
    %0 = vector.load %arg3[%c0, %c0_0, %c0_1, %c0_2] : memref<1x1x8x32xbf16, #tpu.memory_space<vmem>>, vector<1x1x8x32xbf16>
    %1 = vector.shape_cast %0 : vector<1x1x8x32xbf16> to vector<8x32xbf16>
    %c0_3 = arith.constant 0 : index
    %c0_4 = arith.constant 0 : index
    %c0_5 = arith.constant 0 : index
    %2 = vector.load %arg4[%c0_3, %c0_4, %c0_5] : memref<1x32x8xbf16, #tpu.memory_space<vmem>>, vector<1x32x8xbf16>
    %3 = vector.shape_cast %2 : vector<1x32x8xbf16> to vector<32x8xbf16>
    %cst = arith.constant dense<0.000000e+00> : vector<8x8xf32>
    %4 = tpu.matmul %1, %3, %cst {dimension_numbers = #tpu.dot_dimension_numbers<[1], [0], [0], [1], [0, 0, 1, 1], [], []>} : vector<8x32xbf16>, vector<32x8xbf16>, vector<8x8xf32> -> vector<8x8xf32>
    %c0_6 = arith.constant 0 : index
    %c0_7 = arith.constant 0 : index
    %c0_8 = arith.constant 0 : index
    %5 = vector.load %arg5[%c0_6, %c0_7, %c0_8] : memref<1x1x8xf32, #tpu.memory_space<vmem>>, vector<1x1x8xf32>
    %6 = vector.shape_cast %5 : vector<1x1x8xf32> to vector<1x8xf32>
    %7 = vector.broadcast %6 : vector<1x8xf32> to vector<8x8xf32>
    %8 = arith.addf %4, %7 : vector<8x8xf32>
    %9 = arith.truncf %8 : vector<8x8xf32> to vector<8x8xbf16>
    %c0_9 = arith.constant 0 : index
    %c0_10 = arith.constant 0 : index
    %c0_11 = arith.constant 0 : index
    %c0_12 = arith.constant 0 : index
    %10 = vector.load %arg6[%c0_9, %c0_10, %c0_11, %c0_12] : memref<1x1x8x8xbf16, #tpu.memory_space<vmem>>, vector<1x1x8x8xbf16>
    %11 = vector.shape_cast %10 : vector<1x1x8x8xbf16> to vector<8x8xbf16>
    %12 = vector.shape_cast %9 : vector<8x8xbf16> to vector<1x1x8x8xbf16>
    tpu.vector_store %arg6[%c0_9, %c0_10, %c0_11, %c0_12], %12 {strides = array<i32>} : memref<1x1x8x8xbf16, #tpu.memory_space<vmem>>, vector<1x1x8x8xbf16>,
    return
  }
  func.func @transform_0(%arg0: i32, %arg1: i32, %arg2: i32) -> (i32, i32, i32, i32) {
    %c4_i32 = arith.constant 4 : i32
    %0 = arith.cmpi slt, %arg2, %c4_i32 : i32
    %c6_i32 = arith.constant 6 : i32
    %1 = arith.cmpi slt, %arg2, %c6_i32 : i32
    %c1_i32 = arith.constant 1 : i32
    %c2_i32 = arith.constant 2 : i32
    %2 = arith.select %1, %c1_i32, %c2_i32 : i32
    %c0_i32 = arith.constant 0 : i32
    %3 = arith.select %0, %c0_i32, %2 : i32
    %c0_i32_0 = arith.constant 0 : i32
    %c0_i32_1 = arith.constant 0 : i32
    return %3, %arg0, %arg1, %c0_i32_0 : i32, i32, i32, i32
  }
  func.func @transform_1(%arg0: i32, %arg1: i32, %arg2: i32) -> (i32, i32, i32) {
    %c0_i32 = arith.constant 0 : i32
    %c0_i32_0 = arith.constant 0 : i32
    %c0_i32_1 = arith.constant 0 : i32
    return %arg2, %c0_i32, %c0_i32_0 : i32, i32, i32
  }
  func.func @transform_2(%arg0: i32, %arg1: i32, %arg2: i32) -> (i32, i32, i32) {
    %c0_i32 = arith.constant 0 : i32
    %c0_i32_0 = arith.constant 0 : i32
    %c0_i32_1 = arith.constant 0 : i32
    return %arg2, %c0_i32, %c0_i32_0 : i32, i32, i32
  }
  func.func @transform_3(%arg0: i32, %arg1: i32, %arg2: i32) -> (i32, i32, i32, i32) {
    %c0_i32 = arith.constant 0 : i32
    %c0_i32_0 = arith.constant 0 : i32
    return %arg0, %arg2, %arg1, %c0_i32 : i32, i32, i32, i32
  }
}

</mosaic_0001>

<bundles_post_ra>
// kernel: tpu_custom_call.1
= control target key start
LH: loop header
LB: loop body
LE: loop exit
PB: predicated region body
PF: predicated region fallthrough
CT: control target
= control target key end

     0   :  { %s841_s0 = inlined_call_operand.vmem [shape: bf16[3,2,8,32], index: 0, kind: input, shape index: {}]   ;;  %s842_s1 = inlined_call_operand.vmem [shape: bf16[8,32,8], index: 1, kind: input, shape index: {}]   ;;  %s843_s2 = inlined_call_operand.vmem [shape: f32[8,1,8], index: 2, kind: input, shape index: {}]   ;;  %s844_s3 = inlined_call_operand.hbm [shape: bf16[2,8,8,8], index: 3, kind: output, shape index: {}]  }
   0x1   :  { %846 = sst [smem:[#allocation6_spill]] %s842_s1 }
   0x2   :  { %8 = vsyncpa [#allocation3], 0 }
   0x3   :  { %10 = vsyncpa [#allocation3 + $0x1], 0  ;;  %s696_s12 = smov 0   ;;  %s698_s13 = smov 0  }
   0x4   :  { %s700_s14 = smov 0   ;;  %s702_s15 = smov 0  }
   0x5   :  { %s704_s16 = smov 0   ;;  %s706_s17 = smov 0  }
   0x6   :  { %s708_s18 = smov 0   ;;  %s710_s19 = smov 0  }
   0x7 LB: > { %s471_s20 = sadd.s32 4294967295, %s671_s19   ;;  %s472_s21 = sadd.s32 4294967294, %s671_s19   ;;  %s671_s19 = sphi %s710_s19, %s16_s19   ;;  %s667_s18 = sphi %s708_s18, %s858_s18   ;;  %s663_s17 = sphi %s706_s17, %s857_s17   ;;  %s659_s16 = sphi %s704_s16, %s856_s16   ;;  %s655_s15 = sphi %s702_s15, %s855_s15   ;;  %s651_s14 = sphi %s700_s14, %s854_s14   ;;  %s647_s13 = sphi %s698_s13, %s853_s13   ;;  %s643_s12 = sphi %s696_s12, %s852_s12  }
   0x8   : > { %s28_s22 = sadd.s32 1, %s663_s17  ;;  %s35_s23 = sadd.s32 1, %s667_s18 }
   0x9   : > { %p29_p0 = scmp.ge.s32.totalorder %s28_s22, 8  ;;  %p146_p1 = scmp.ne.s32.totalorder %s651_s14, %s647_s13 }
   0xa   : > { %p147_p2 = scmp.eq.s32.totalorder %s471_s20, 15  ;;  %p152_p5 = scmp.ne.s32.totalorder %s647_s13, %s643_s12 }
   0xb   : > { %s860_s22 = smov (%p29_p0, %s28_s22), 0  ;;  %s862_s23 = smov (!%p29_p0, %s35_s23), %s667_s18 }
   0xc   : > { %s130_s24 = ssub.s32 %s663_s17, %s860_s22  ;;  %p747_p3 = por %p147_p2, %p146_p1 }
   0xd   : > { %p37_p4 = scmp.ge.s32.totalorder %s862_s23, 2  ;;  %p153_p6 = scmp.eq.s32.totalorder %s472_s21, 15 }
   0xe   : > { %p475_p7 = scmp.ge.s32.totalorder %s671_s19, 1  ;;  %p207_p9 = scmp.lt.s32.totalorder %s671_s19, 17 }
   0xf   : > { %s864_s23 = smov (%p37_p4, %s862_s23), 0  ;;  %p756_p8 = por %p153_p6, %p152_p5 }
  0x10   : > { %848 = sst [smem:[#allocation5_spill]] %s864_s23  ;;  %s129_s27 = ssub.s32 %s667_s18, %s864_s23 }
  0x11   : > { %s136_s28 = sadd.s32 1, %s651_s14  ;;  %s131_s29 = sor.u32 %s130_s24, %s129_s27 }
  0x12   : > { %p208_p10 = pnand %p475_p7, %p207_p9  ;;  %p134_p11 = scmp.eq.s32.totalorder %s131_s29, 0 }
  0x13   : > { %p268_p12 = scmp.lt.s32.totalorder (!%p208_p10), %s655_s15, 7  ;;  %v673_v0 = vmov (!%p208_p10), 0.0   ;;  %vm674_vm0 = vmmov (!%p208_p10), 0   ;;  %p249_p13 = scmp.lt.s32.totalorder (!%p208_p10), %s655_s15, 4  ;;  %vm301_vm1 = vcmask (!%p208_p10), 261120   ;;  %vm346_vm2 = vcmask (!%p208_p10), 60416  }
  0x14   : > { %s765_s30 = scalar_select %p134_p11, %s651_s14, %s136_s28  }
  0x15   : > { %211 = sbr.rel (%p208_p10) target bundleno = 270 (0x10e), region = 32  ;;  %494 = vmatprep.subr.bf16.mxu0 (!%p208_p10), %v673_v0  ;;  %498 = vmatprep.mubr.msk.bf16.mxu0 (!%p208_p10), %vm674_vm0, %v673_v0  ;;  %p250_p0 = scmp.lt.s32.totalorder (!%p208_p10), %s655_s15, 6 }
  0x16   : > { %s850_s1 = sld [smem:[#allocation6_spill]] (!%p208_p10)  ;;  %p255_p1 = scmp.lt.s32.totalorder (!%p208_p10), %s659_s16, 1 }
  0x17   : > { %s246_s29 = sand.u32 (!%p208_p10), 1, %s647_s13   ;;  %s486_s7 = sshll.u32 (!%p208_p10), %s659_s16, 3 }
  0x18   : > { %s361_s23 = sadd.s32 (!%p208_p10), %s655_s15, %s486_s7 }
  0x1c   : > { %s269_s4 = scalar_select %p268_p12, %s655_s15, 7 }
  0x1d   : > { %s251_s5 = scalar_select %p250_p0, 1, 2 }
  0x1e   : > { %s490_s6 = sshll.u32 %s269_s4, 4 }
  0x1f   : > { %s272_s9 = scalar_lea.vmem %s850_s1, %s490_s6  ;;  %s866_s5 = smov (%p249_p13, %s251_s5), 0 }
  0x20   : > { %v575_v1 = vld [vmem:[%s272_s9] sm:$0xff]   ;;  %v576_v2 = vld [vmem:[%s272_s9 + $0x8] sm:$0xff]   ;;  %p253_p2 = scmp.lt.s32.totalorder %s866_s5, 2  ;;  %s476_s6 = sshll.u32 %s246_s29, 2 }
  0x21   : > { %495 = vmatpush3.bf16.msra.mxu0 %v575_v1  ;;  %s256_s10 = scalar_select %p255_p1, %s659_s16, 1 }
  0x22   : > { %496 = vmatprep.subr.bf16.mxu0 %v673_v0  ;;  %s868_s5 = smov (!%p253_p2, %s866_s5), 2  ;;  %s275_s1 = scalar_lea.vmem %s843_s2, %s269_s4 }
  0x23   : > { %s477_s11 = sshll.u32 %s868_s5, 1  ;;  %v481_v4 = vld [vmem:[%s275_s1] ss:$0 sm:$0xff]  ;;  %s487_s5 = sshll.u32 %s361_s23, 6 }
  0x24   : > { %s261_s20 = sadd.s32 %s477_s11, %s256_s10  ;;  %s248_s10 = scalar_lea.vmem [#allocation2], %s476_s6 }
  0x25   : > { %497 = vmatpush3.bf16.msra.mxu0 %v576_v2  ;;  %s478_s21 = sshll.u32 %s261_s20, 2  ;;  %s365_s11 = sshll.u32 %s248_s10, 4  ;;  %s790_s11 = int_to_ptr.vmem [resolvable:$true] %s365_s11 }
  0x26   : > { %s263_s28 = scalar_lea.vmem %s841_s0, %s478_s21  ;;  %s788_s16 = scalar_lea.hbm %s844_s3, %s487_s5 }
  0x27   : > { %v277_v3 = vld [vmem:[%s263_s28] sm:$0xf]  ;;  %s349_s1 = scalar_lea.sflag [#allocation3], %s246_s29  ;;  %s577_s15 = scalar_lea.vmem %s790_s11, 64 }
  0x28   : > { %499 = vmatmul.mubr.msk.bf16.vlgmr.msra.gmra.mrb[0].mxu0 %vm301_vm1, %v277_v3  ;;  %p578_p4 = scmp.ne.s32.totalorder %s790_s11, %s577_s15  ;;  %s675_s23 = smov [#allocation2]  }
  0x29   : > { %s581_s4 = sshll.u32 %s675_s23, 4  ;;  %s582_s4 = int_to_ptr.vmem [resolvable:$false] %s581_s4 }
  0x2a   : > { %p579_p5 = pnand %p578_p4, %p747_p3  ;;  %s583_s24 = scalar_lea.vmem %s582_s4, 128 }
  0x2b   : > { %p584_p7 = scmp.lt.s32.totalorder %s790_s11, %s582_s4  ;;  %p585_p9 = scmp.lt.s32.totalorder %s583_s24, %s577_s15 }
  0x2c   : > { %p580_p6 = pneg %p579_p5 }
  0x2d   : > { %p586_p10 = por %p585_p9, %p584_p7 }
  0x2f   : > { %p587_p11 = pnand %p586_p10, %p580_p6 }
  0xfb   : > { %v339_v5 = vpop.f32.mrb[0].mxu0 }
  0xfc   : > { %v340_v6 = vadd.f32 %v481_v4, %v339_v5  ;;  %v500_v7 = vpop.f32.mrb[1].mxu0 }
  0xfd   : > { %v342_v8 = vpop.f32.mrb[2].mxu0 }
  0xfe   : > { %v345_v9 = vpack.c.bf16 %v340_v6, %v340_v6  ;;  %v501_v10 = vpop.f32.mrb[3].mxu0 }
 0x100   : > { %347 = vst.msk [vmem:[%s248_s10] sm:$0xf] %vm346_vm2, %v345_v9 }
 0x101   : > { %590 = shalt.err (!%p587_p11)
}
 0x102   : > { %s591_s27 = scalar_lea.hbm %s788_s16, 64  ;;  %s595_s6 = scalar_lea.hbm %s844_s3, 1024 }
 0x103   : > { %p592_p12 = scmp.ne.s32.totalorder %s788_s16, %s591_s27  ;;  %p596_p1 = scmp.lt.u32.totalorder %s788_s16, %s844_s3 }
 0x104   : > { %p597_p2 = scmp.lt.u32.totalorder %s595_s6, %s591_s27  ;;  %p599_p5 = scmp.lt.u32.totalorder %s591_s27, %s788_s16 }
 0x105   : > { %p593_p13 = pnand %p592_p12, %p747_p3 }
 0x106   : > { %p598_p4 = por %p597_p2, %p596_p1 }
 0x107   : > { %p594_p0 = pneg %p593_p13 }
 0x108   : > { %p600_p6 = por %p599_p5, %p598_p4 }
 0x10a   : > { %p601_p7 = pnand %p600_p6, %p594_p0 }
 0x10c   : > { %604 = shalt.err (!%p601_p7)
}
 0x10d   : > { %502 = dma.vmem_to_hbm [thread:$0]  (%p747_p3), %s790_s11, 64, %s788_s16, %s349_s1  }
 0x10e PF: > { %p508_p9 = scmp.ge.s32.totalorder %s671_s19, 2  ;;  %s377_s9 = sand.u32 1, %s643_s12  }
 0x10f   : > { %s378_s5 = scalar_lea.sflag [#allocation3], %s377_s9 }
 0x110   : > { %p505_p10 = pnand %p508_p9, %p756_p8 }
 0x112   : > { %638 = dma.done.wait (!%p505_p10), %s378_s5, 64  }
 0x113   : > { %640 = vsyncadd (!%p505_p10), %s378_s5, 4294967232  ;;  %s16_s19 = sadd.s32 1, %s671_s19   ;;  %s851_s25 = sld [smem:[#allocation5_spill]] }
 0x114   : > { %p13_p11 = scmp.ge.s32.totalorder %s16_s19, 18   ;;  %s852_s12 = smov %s647_s13 }
 0x115   : > { %s853_s13 = smov %s651_s14  ;;  %s854_s14 = smov %s765_s30 }
 0x116   : > { %s855_s15 = smov %s663_s17  ;;  %s856_s16 = smov %s667_s18 }
 0x117   : > { %s857_s17 = smov %s860_s22  ;;  %15 = sbr.rel (!%p13_p11) target bundleno = 7 (0x7), region = 73 }
 0x119   : > { %s858_s18 = smov %s851_s25 }
 0x11e   :  { %383 = vsyncpa [#allocation3], 1 }
 0x11f   :  { %385 = vsyncpa [#allocation3 + $0x1], 1 }

</bundles_post_ra>
